<compile_context>
chip_gen: v5e
topology: v5e:2x2
jax: 0.10.0
libtpu: 0.0.40
codegen_flags: <defaults>
</compile_context>

<pallas_src>
import functools
import math

import jax
import jax.numpy as jnp
from jax import lax
from jax.experimental import pallas as pl
from jax.experimental.pallas import tpu as pltpu

HIDDEN = 128  # hidden width fixed by the module spec


def _round_up(x, m):
    return ((x + m - 1) // m) * m


def _cdiv(a, b):
    return -(-a // b)


def _mlp_kernel(x_ref, w1_ref, w23_ref, b_ref, q_ref, act_ref, *, n_actions):
    """One batch tile of Linear->ReLU->Linear->ReLU->Linear (+ greedy argmax).

    x_ref   : [TB, n_obs]         f32      (batch-tiled)
    w1_ref  : [n_obs, HIDDEN]     f32      (resident; consumed on the VPU for small n_obs)
    w23_ref : [2, HIDDEN, HIDDEN] f32/bf16 (w2|w3, w3 zero-padded to 128 cols, resident)
    b_ref   : [3, HIDDEN]         f32      (b1|b2|b3 zero-padded, resident)
    q_ref   : [TB, HIDDEN]        f32      (lane-dense Q slab; cols >= n_actions are 0)
    act_ref : [TB, 1]             i32      (argmax over the real action columns)
    """
    x = x_ref[...]                       # [TB, n_obs] f32
    b = b_ref[...]                       # [3, HIDDEN] f32
    n_obs = x.shape[-1]
    mm_dtype = w23_ref.dtype             # bf16 weights -> bf16 MXU operands

    # ---- layer 1 + ReLU -----------------------------------------------------
    if n_obs <= 8:
        # Tiny contraction: n_obs unrolled broadcast-FMAs on the VPU beat a
        # masked K=n_obs MXU pass and sidestep small-K matmul layouts entirely.
        w1 = w1_ref[...]                 # [n_obs, HIDDEN] f32
        h = jnp.zeros((x.shape[0], HIDDEN), jnp.float32) + b[0:1, :]
        for k in range(n_obs):           # static unroll (n_obs is trace-time)
            h = h + x[:, k:k + 1] * w1[k:k + 1, :]
    else:
        h = jnp.dot(x, w1_ref[...], preferred_element_type=jnp.float32) + b[0:1, :]
    h = jnp.maximum(h, 0.0)              # f32 elementwise (v5e-safe)

    # ---- layer 2 + ReLU -----------------------------------------------------
    h = jnp.dot(h.astype(mm_dtype), w23_ref[0],
                preferred_element_type=jnp.float32) + b[1:2, :]
    h = jnp.maximum(h, 0.0)

    # ---- layer 3 ------------------------------------------------------------
    q = jnp.dot(h.astype(mm_dtype), w23_ref[1],
                preferred_element_type=jnp.float32) + b[2:3, :]
    q_ref[...] = q.astype(q_ref.dtype)

    # ---- fused greedy-action epilogue ---------------------------------------
    # Padded action columns (zero weights + zero bias -> Q == 0) are masked to
    # -inf so they can never be selected even when all real Q-values < 0.
    col = lax.broadcasted_iota(jnp.int32, q.shape, 1)
    masked = jnp.where(col < n_actions, q, -jnp.inf)
    row_max = jnp.max(masked, axis=-1, keepdims=True)
    idx = jnp.where(masked == row_max, col, HIDDEN)
    act_ref[...] = jnp.min(idx, axis=-1, keepdims=True).astype(jnp.int32)


def pack_params(params, *, matmul_dtype=jnp.bfloat16):
    """Pack (w1,b1,w2,b2,w3,b3) for the kernel.  Call once per parameter update.

    Returns:
      w1   : [n_obs, 128] f32            (kept f32: tiny, consumed on the VPU)
      w23  : [2, 128, 128] matmul_dtype  (w2 | w3 zero-padded on output columns)
      bias : [3, 128] f32                (b1 | b2 | b3 zero-padded)
      n_actions : int
    bf16 is the default on every TPU generation (the MXU is bf16-native on
    v5e/v6e/v7x); biases, ReLU and accumulation stay f32.
    """
    w1, b1, w2, b2, w3, b3 = params
    n_actions = w3.shape[1]
    if n_actions > HIDDEN:
        # TODO(synk): N-tile the last matmul for n_actions > 128 (not needed for DQN).
        raise NotImplementedError("n_actions must be <= 128")

    w3_p = jnp.zeros((HIDDEN, HIDDEN), jnp.float32).at[:, :n_actions].set(
        w3.astype(jnp.float32))
    w23 = jnp.stack([w2.astype(jnp.float32), w3_p]).astype(matmul_dtype)

    def pad_b(bias):
        bias = bias.reshape(-1).astype(jnp.float32)
        return jnp.zeros((HIDDEN,), jnp.float32).at[: bias.shape[0]].set(bias)

    bias = jnp.stack([pad_b(b1), pad_b(b2), pad_b(b3)])  # [3,128] f32
    return w1.astype(jnp.float32), w23, bias, n_actions


def net_apply(x, w1, w23, bias, n_actions, *, block_b=512):
    """Fused forward. x: [B, n_obs] f32 -> (q_slab [B,128] f32, action [B,1] i32)."""
    B, n_obs = x.shape
    assert n_obs == w1.shape[0], "x feature dim must match layer-1 fan-in"
    x = x.astype(jnp.float32)

    # Tile = ceil(B/2) rounded up to the 8-row f32 sublane tile: >=2 grid steps
    # for training batches (both v7x TCs engage via "parallel"), capped at
    # block_b (per-step overhead ~0.35us; weights resident so per-step DMA is
    # only x/out tiles; VMEM stays a few hundred KB even on v7x).
    TB = min(block_b, max(8, _round_up(_cdiv(B, 2), 8)))
    grid = _cdiv(B, TB)

    kernel = functools.partial(_mlp_kernel, n_actions=n_actions)

    q_slab, action = pl.pallas_call(
        kernel,
        out_shape=(
            jax.ShapeDtypeStruct((B, HIDDEN), jnp.float32),
            jax.ShapeDtypeStruct((B, 1), jnp.int32),
        ),
        grid_spec=pltpu.PrefetchScalarGridSpec(
            num_scalar_prefetch=0,
            grid=(grid,),
            in_specs=[
                pl.BlockSpec((TB, n_obs), lambda i: (i, 0)),             # x: batch-tiled
                pl.BlockSpec((n_obs, HIDDEN), lambda i: (0, 0)),         # w1: resident
                pl.BlockSpec((2, HIDDEN, HIDDEN), lambda i: (0, 0, 0)),  # w2|w3: resident
                pl.BlockSpec((3, HIDDEN), lambda i: (0, 0)),             # biases: resident
            ],
            out_specs=(
                pl.BlockSpec((TB, HIDDEN), lambda i: (i, 0)),            # lane-dense Q slab
                pl.BlockSpec((TB, 1), lambda i: (i, 0)),                 # greedy action
            ),
        ),
        compiler_params=pltpu.CompilerParams(
            dimension_semantics=("parallel",),  # shard batch tiles across v7x's 2 TCs
        ),
    )(x, w1, w23, bias)
    return q_slab, action


def net_forward(x, w1, w23, bias, n_actions, **kwargs):
    """Module-compatible view: (Q [B, n_actions], greedy action [B, 1]).

    The [:, :n_actions] slice exists only for parity with the PyTorch module /
    reference; a real DQN loop should consume (q_slab, action) from net_apply
    directly (lane-dense Q + in-kernel argmax) and skip this slice entirely.
    """
    q_slab, action = net_apply(x, w1, w23, bias, n_actions, **kwargs)
    return q_slab[:, :n_actions], action


def init_params(key, n_observations, n_actions):
    """Deterministic init mirroring torch.nn.Linear default U(-1/sqrt(fan_in), +)."""
    def linear(key, fan_in, fan_out):
        kw, kb = jax.random.split(key)
        bound = 1.0 / math.sqrt(fan_in)
        # Stored as [in, out] (transpose of PyTorch's [out, in]).
        w = jax.random.uniform(kw, (fan_in, fan_out), jnp.float32, -bound, bound)
        b = jax.random.uniform(kb, (1, fan_out), jnp.float32, -bound, bound)
        return w, b

    k1, k2, k3 = jax.random.split(key, 3)
    w1, b1 = linear(k1, n_observations, HIDDEN)
    w2, b2 = linear(k2, HIDDEN, HIDDEN)
    w3, b3 = linear(k3, HIDDEN, n_actions)
    return (w1, b1, w2, b2, w3, b3)


def net_forward_ref(x, params):
    """Plain-JAX reference for correctness checking."""
    w1, b1, w2, b2, w3, b3 = params
    h1 = jnp.maximum(x @ w1 + b1, 0.0)
    h2 = jnp.maximum(h1 @ w2 + b2, 0.0)
    return h2 @ w3 + b3


if __name__ == "__main__":
    key = jax.random.PRNGKey(0)
    k_params, k_x = jax.random.split(key)

    batch = 8
    n_observations = 4   # e.g. CartPole observation dim
    n_actions = 2        # e.g. CartPole action dim

    params = init_params(k_params, n_observations, n_actions)
    x = jax.random.normal(k_x, (batch, n_observations), jnp.float32)

    # --- exact f32 weight path ----------------------------------------------
    w1_f, w23_f, b_f, n_act = pack_params(params, matmul_dtype=jnp.float32)
    q, act = net_forward(x, w1_f, w23_f, b_f, n_act)
    jax.block_until_ready(q)
    ref = net_forward_ref(x, params)
    assert q.shape == (batch, n_actions)
    assert act.shape == (batch, 1)
    assert jnp.allclose(q, ref, atol=1e-5, rtol=1e-5), "f32 mismatch vs reference"
    assert jnp.array_equal(act[:, 0], jnp.argmax(ref, axis=-1)), "argmax mismatch (f32)"

    # --- default bf16 weight path (all generations), ragged batch ------------
    x2 = jax.random.normal(jax.random.PRNGKey(1), (37, n_observations), jnp.float32)
    w1_b, w23_b, b_b, _ = pack_params(params)  # bf16 default
    q2, act2 = net_forward(x2, w1_b, w23_b, b_b, n_act)
    jax.block_until_ready(q2)
    ref2 = net_forward_ref(x2, params)
    assert q2.shape == (37, n_actions)
    assert jnp.allclose(q2, ref2, atol=5e-2, rtol=5e-2), "bf16 mismatch vs reference"
    # Fused argmax must agree exactly with an argmax over the kernel's own Q.
    assert jnp.array_equal(act2[:, 0], jnp.argmax(q2, axis=-1)), "argmax mismatch (bf16)"

    print("KERNEL_OK")
</pallas_src>

<mosaic_0001>
module attributes {stable_mosaic.version = 11 : i64} {
  func.func @_mlp_kernel(%arg0: i32, %arg1: memref<8x4xf32, #tpu.memory_space<vmem>>, %arg2: memref<4x128xf32, #tpu.memory_space<vmem>>, %arg3: memref<2x128x128xf32, #tpu.memory_space<vmem>>, %arg4: memref<3x128xf32, #tpu.memory_space<vmem>>, %arg5: memref<8x128xf32, #tpu.memory_space<vmem>>, %arg6: memref<8x1xi32, #tpu.memory_space<vmem>>) attributes {dimension_semantics = [#tpu.dimension_semantics<parallel>], iteration_bounds = array<i64: 1>, scalar_prefetch = 0 : i64, scratch_operands = 0 : i64, tpu.core_type = #tpu.core_type<tc>, window_params = [{transform_indices = @transform_0, window_bounds = array<i64: 8, 4>}, {pipeline_mode = #tpu.pipeline_mode<synchronous>, transform_indices = @transform_1, window_bounds = array<i64: 4, 128>}, {pipeline_mode = #tpu.pipeline_mode<synchronous>, transform_indices = @transform_2, window_bounds = array<i64: 2, 128, 128>}, {pipeline_mode = #tpu.pipeline_mode<synchronous>, transform_indices = @transform_3, window_bounds = array<i64: 3, 128>}, {transform_indices = @transform_4, window_bounds = array<i64: 8, 128>}, {transform_indices = @transform_5, window_bounds = array<i64: 8, 1>}]} {
    %c0 = arith.constant 0 : index
    %c0_0 = arith.constant 0 : index
    %0 = vector.load %arg1[%c0, %c0_0] : memref<8x4xf32, #tpu.memory_space<vmem>>, vector<8x4xf32>
    %c0_1 = arith.constant 0 : index
    %c0_2 = arith.constant 0 : index
    %1 = vector.load %arg4[%c0_1, %c0_2] : memref<3x128xf32, #tpu.memory_space<vmem>>, vector<3x128xf32>
    %c0_3 = arith.constant 0 : index
    %c0_4 = arith.constant 0 : index
    %2 = vector.load %arg2[%c0_3, %c0_4] : memref<4x128xf32, #tpu.memory_space<vmem>>, vector<4x128xf32>
    %cst = arith.constant 0.000000e+00 : f32
    %3 = vector.broadcast %cst : f32 to vector<8x128xf32>
    %4 = vector.extract_strided_slice %1 {offsets = [0, 0], sizes = [1, 128], strides = [1, 1]} : vector<3x128xf32> to vector<1x128xf32>
    %5 = vector.broadcast %4 : vector<1x128xf32> to vector<8x128xf32>
    %6 = arith.addf %3, %5 : vector<8x128xf32>
    %7 = vector.extract_strided_slice %0 {offsets = [0, 0], sizes = [8, 1], strides = [1, 1]} : vector<8x4xf32> to vector<8x1xf32>
    %8 = vector.extract_strided_slice %2 {offsets = [0, 0], sizes = [1, 128], strides = [1, 1]} : vector<4x128xf32> to vector<1x128xf32>
    %9 = vector.broadcast %7 : vector<8x1xf32> to vector<8x128xf32>
    %10 = vector.broadcast %8 : vector<1x128xf32> to vector<8x128xf32>
    %11 = arith.mulf %9, %10 : vector<8x128xf32>
    %12 = arith.addf %6, %11 : vector<8x128xf32>
    %13 = vector.extract_strided_slice %0 {offsets = [0, 1], sizes = [8, 1], strides = [1, 1]} : vector<8x4xf32> to vector<8x1xf32>
    %14 = vector.extract_strided_slice %2 {offsets = [1, 0], sizes = [1, 128], strides = [1, 1]} : vector<4x128xf32> to vector<1x128xf32>
    %15 = vector.broadcast %13 : vector<8x1xf32> to vector<8x128xf32>
    %16 = vector.broadcast %14 : vector<1x128xf32> to vector<8x128xf32>
    %17 = arith.mulf %15, %16 : vector<8x128xf32>
    %18 = arith.addf %12, %17 : vector<8x128xf32>
    %19 = vector.extract_strided_slice %0 {offsets = [0, 2], sizes = [8, 1], strides = [1, 1]} : vector<8x4xf32> to vector<8x1xf32>
    %20 = vector.extract_strided_slice %2 {offsets = [2, 0], sizes = [1, 128], strides = [1, 1]} : vector<4x128xf32> to vector<1x128xf32>
    %21 = vector.broadcast %19 : vector<8x1xf32> to vector<8x128xf32>
    %22 = vector.broadcast %20 : vector<1x128xf32> to vector<8x128xf32>
    %23 = arith.mulf %21, %22 : vector<8x128xf32>
    %24 = arith.addf %18, %23 : vector<8x128xf32>
    %25 = vector.extract_strided_slice %0 {offsets = [0, 3], sizes = [8, 1], strides = [1, 1]} : vector<8x4xf32> to vector<8x1xf32>
    %26 = vector.extract_strided_slice %2 {offsets = [3, 0], sizes = [1, 128], strides = [1, 1]} : vector<4x128xf32> to vector<1x128xf32>
    %27 = vector.broadcast %25 : vector<8x1xf32> to vector<8x128xf32>
    %28 = vector.broadcast %26 : vector<1x128xf32> to vector<8x128xf32>
    %29 = arith.mulf %27, %28 : vector<8x128xf32>
    %30 = arith.addf %24, %29 : vector<8x128xf32>
    %cst_5 = arith.constant 0.000000e+00 : f32
    %31 = vector.broadcast %cst_5 : f32 to vector<8x128xf32>
    %32 = arith.maximumf %30, %31 : vector<8x128xf32>
    %c0_6 = arith.constant 0 : index
    %c0_7 = arith.constant 0 : index
    %c0_8 = arith.constant 0 : index
    %33 = vector.load %arg3[%c0_6, %c0_7, %c0_8] : memref<2x128x128xf32, #tpu.memory_space<vmem>>, vector<1x128x128xf32>
    %34 = vector.shape_cast %33 : vector<1x128x128xf32> to vector<128x128xf32>
    %cst_9 = arith.constant dense<0.000000e+00> : vector<8x128xf32>
    %35 = tpu.matmul %32, %34, %cst_9 {dimension_numbers = #tpu.dot_dimension_numbers<[1], [0], [0], [1], [0, 0, 1, 1], [], []>} : vector<8x128xf32>, vector<128x128xf32>, vector<8x128xf32> -> vector<8x128xf32>
    %36 = vector.extract_strided_slice %1 {offsets = [1, 0], sizes = [1, 128], strides = [1, 1]} : vector<3x128xf32> to vector<1x128xf32>
    %37 = vector.broadcast %36 : vector<1x128xf32> to vector<8x128xf32>
    %38 = arith.addf %35, %37 : vector<8x128xf32>
    %cst_10 = arith.constant 0.000000e+00 : f32
    %39 = vector.broadcast %cst_10 : f32 to vector<8x128xf32>
    %40 = arith.maximumf %38, %39 : vector<8x128xf32>
    %c1 = arith.constant 1 : index
    %c0_11 = arith.constant 0 : index
    %c0_12 = arith.constant 0 : index
    %41 = vector.load %arg3[%c1, %c0_11, %c0_12] : memref<2x128x128xf32, #tpu.memory_space<vmem>>, vector<1x128x128xf32>
    %42 = vector.shape_cast %41 : vector<1x128x128xf32> to vector<128x128xf32>
    %cst_13 = arith.constant dense<0.000000e+00> : vector<8x128xf32>
    %43 = tpu.matmul %40, %42, %cst_13 {dimension_numbers = #tpu.dot_dimension_numbers<[1], [0], [0], [1], [0, 0, 1, 1], [], []>} : vector<8x128xf32>, vector<128x128xf32>, vector<8x128xf32> -> vector<8x128xf32>
    %44 = vector.extract_strided_slice %1 {offsets = [2, 0], sizes = [1, 128], strides = [1, 1]} : vector<3x128xf32> to vector<1x128xf32>
    %45 = vector.broadcast %44 : vector<1x128xf32> to vector<8x128xf32>
    %46 = arith.addf %43, %45 : vector<8x128xf32>
    %c0_14 = arith.constant 0 : index
    %c0_15 = arith.constant 0 : index
    %47 = vector.load %arg5[%c0_14, %c0_15] : memref<8x128xf32, #tpu.memory_space<vmem>>, vector<8x128xf32>
    tpu.vector_store %arg5[%c0_14, %c0_15], %46 {strides = array<i32>} : memref<8x128xf32, #tpu.memory_space<vmem>>, vector<8x128xf32>,
    %48 = tpu.iota {dimensions = array<i32: 1>} : vector<8x128xi32>
    %c2_i32 = arith.constant 2 : i32
    %49 = vector.broadcast %c2_i32 : i32 to vector<8x128xi32>
    %50 = arith.cmpi slt, %48, %49 : vector<8x128xi32>
    %cst_16 = arith.constant 0xFF800000 : f32
    %51 = vector.broadcast %cst_16 : f32 to vector<8x128xf32>
    %52 = arith.select %50, %46, %51 : vector<8x128xi1>, vector<8x128xf32>
    %cst_17 = arith.constant dense<0xFF800000> : vector<8xf32>
    %53 = vector.multi_reduction <maximumf>, %52, %cst_17 [1] : vector<8x128xf32> to vector<8xf32>
    %54 = vector.shape_cast %53 : vector<8xf32> to vector<8x1xf32>
    %55 = vector.broadcast %54 : vector<8x1xf32> to vector<8x128xf32>
    %56 = arith.cmpf oeq, %52, %55 : vector<8x128xf32>
    %c128_i32 = arith.constant 128 : i32
    %57 = vector.broadcast %c128_i32 : i32 to vector<8x128xi32>
    %58 = arith.select %56, %48, %57 : vector<8x128xi1>, vector<8x128xi32>
    %cst_18 = arith.constant dense<2147483647> : vector<8xi32>
    %59 = vector.multi_reduction <minsi>, %58, %cst_18 [1] : vector<8x128xi32> to vector<8xi32>
    %60 = vector.shape_cast %59 : vector<8xi32> to vector<8x1xi32>
    %c0_19 = arith.constant 0 : index
    %c0_20 = arith.constant 0 : index
    %61 = vector.load %arg6[%c0_19, %c0_20] : memref<8x1xi32, #tpu.memory_space<vmem>>, vector<8x1xi32>
    tpu.vector_store %arg6[%c0_19, %c0_20], %60 {strides = array<i32>} : memref<8x1xi32, #tpu.memory_space<vmem>>, vector<8x1xi32>,
    return
  }
  func.func @transform_0(%arg0: i32) -> (i32, i32) {
    %c0_i32 = arith.constant 0 : i32
    %c0_i32_0 = arith.constant 0 : i32
    return %arg0, %c0_i32 : i32, i32
  }
  func.func @transform_1(%arg0: i32) -> (i32, i32) {
    %c0_i32 = arith.constant 0 : i32
    %c0_i32_0 = arith.constant 0 : i32
    %c0_i32_1 = arith.constant 0 : i32
    return %c0_i32, %c0_i32_0 : i32, i32
  }
  func.func @transform_2(%arg0: i32) -> (i32, i32, i32) {
    %c0_i32 = arith.constant 0 : i32
    %c0_i32_0 = arith.constant 0 : i32
    %c0_i32_1 = arith.constant 0 : i32
    %c0_i32_2 = arith.constant 0 : i32
    return %c0_i32, %c0_i32_0, %c0_i32_1 : i32, i32, i32
  }
  func.func @transform_3(%arg0: i32) -> (i32, i32) {
    %c0_i32 = arith.constant 0 : i32
    %c0_i32_0 = arith.constant 0 : i32
    %c0_i32_1 = arith.constant 0 : i32
    return %c0_i32, %c0_i32_0 : i32, i32
  }
  func.func @transform_4(%arg0: i32) -> (i32, i32) {
    %c0_i32 = arith.constant 0 : i32
    %c0_i32_0 = arith.constant 0 : i32
    return %arg0, %c0_i32 : i32, i32
  }
  func.func @transform_5(%arg0: i32) -> (i32, i32) {
    %c0_i32 = arith.constant 0 : i32
    %c0_i32_0 = arith.constant 0 : i32
    return %arg0, %c0_i32 : i32, i32
  }
}

</mosaic_0001>

<bundles_post_ra>
// kernel: tpu_custom_call.1
= control target key start
LH: loop header
LB: loop body
LE: loop exit
PB: predicated region body
PF: predicated region fallthrough
CT: control target
= control target key end

     0   :  { %11 = vsyncpa [#allocation3], 0  ;;  %s314_s0 = inlined_call_operand.vmem [shape: f32[8,4], index: 0, kind: input, shape index: {}]   ;;  %s315_s1 = inlined_call_operand.vmem [shape: f32[4,128], index: 1, kind: input, shape index: {}]   ;;  %s316_s2 = inlined_call_operand.hbm [shape: f32[2,128,128], index: 2, kind: input, shape index: {}]   ;;  %s317_s3 = inlined_call_operand.vmem [shape: f32[3,128], index: 3, kind: input, shape index: {}]   ;;  %s318_s4 = inlined_call_operand.hbm [shape: f32[8,128], index: 4, kind: output, shape index: {0}]   ;;  %s319_s5 = inlined_call_operand.vmem [shape: s32[8,1], index: 5, kind: output, shape index: {1}]  }
   0x1   :  { %12 = vsyncpa [#allocation4], 0  ;;  %s21_s20 = sshll.u32 %s316_s2, 4  ;;  %s258_s21 = smov [#allocation2]   ;;  %s22_s20 = int_to_ptr.hbm [resolvable:$true] %s21_s20 }
   0x2   :  { %s23_s22 = sshll.u32 %s258_s21, 4  ;;  %s259_s23 = smov 128   ;;  %s24_s22 = int_to_ptr.vmem [resolvable:$true] %s23_s22 }
   0x3   :  { %s260_s24 = smov 8  }
   0x4   :  { %29 = dma.hbm_to_vmem [thread:$0]  %s22_s20, 4096, %s24_s22, [#allocation3], %s259_s23, %s259_s23, %s260_s24  }
   0x5   :  { %254 = dma.done.wait [#allocation3], 4096  }
   0x6   :  { %255 = vsyncadd [#allocation3], 4294963200  ;;  %v261_v0 = vmov 0   ;;  %v262_v1 = vmov 2   ;;  %v36_v2 = vld [vmem:[%s314_s0] sm:$0xff]  ;;  %v86_v3 = vld [vmem:[#allocation2 + $0x78] sm:$0xff]  ;;  %v148_v61 = vlaneseq }
   0x7   :  { %201 = vset.pattern.permute.xlu0 %v261_v0  ;;  %203 = vset.pattern.permute.xlu1 %v262_v1  ;;  %v85_v4 = vld [vmem:[#allocation2 + $0x70] sm:$0xff]  ;;  %v84_v5 = vld [vmem:[#allocation2 + $0x68] sm:$0xff]  ;;  %v83_v6 = vld [vmem:[#allocation2 + $0x60] sm:$0xff]  ;;  %v263_v8 = vmov 1   ;;  %v264_v9 = vmov 3   ;;  %s179_s6 = sshll.u32 %s318_s4, 4  ;;  %s180_s6 = int_to_ptr.hbm [resolvable:$true] %s179_s6 }
   0x8   :  { %43 = vperm.xlu0 %201, %v36_v2   ;;  %57 = vperm.xlu1 %203, %v36_v2   ;;  %v82_v7 = vld [vmem:[#allocation2 + $0x58] sm:$0xff]  ;;  %v81_v10 = vld [vmem:[#allocation2 + $0x50] sm:$0xff]  ;;  %v80_v11 = vld [vmem:[#allocation2 + $0x48] sm:$0xff]  ;;  %v149_v62 = vand.u32 127, %v148_v61  ;;  %vm170_vm3 = vcmask 7168  }
   0x9   :  { %88 = vmatpush.msra.mxu0 %v86_v3  ;;  %v79_v12 = vld [vmem:[#allocation2 + $0x40] sm:$0xff]  ;;  %v78_v13 = vld [vmem:[#allocation2 + $0x38] sm:$0xff]  ;;  %v77_v14 = vld [vmem:[#allocation2 + $0x30] sm:$0xff] }
   0xa   :  { %v76_v15 = vld [vmem:[#allocation2 + $0x28] sm:$0xff]  ;;  %v75_v16 = vld [vmem:[#allocation2 + $0x20] sm:$0xff]  ;;  %v74_v17 = vld [vmem:[#allocation2 + $0x18] sm:$0xff]  ;;  %vm150_vm0 = vcmp.lt.s32.totalorder %v149_v62, 2 }
   0xb   :  { %89 = vmatpush.msra.mxu0 %v85_v4  ;;  %v73_v18 = vld [vmem:[#allocation2 + $0x10] sm:$0xff]  ;;  %v72_v19 = vld [vmem:[#allocation2 + $0x8] sm:$0xff]  ;;  %v71_v20 = vld [vmem:[#allocation2] sm:$0xff] }
   0xc   :  { %v125_v21 = vld [vmem:[#allocation2 + $0xf8] sm:$0xff]  ;;  %v124_v22 = vld [vmem:[#allocation2 + $0xf0] sm:$0xff]  ;;  %v123_v23 = vld [vmem:[#allocation2 + $0xe8] sm:$0xff] }
   0xd   :  { %90 = vmatpush.msra.mxu0 %v84_v5  ;;  %127 = vmatpush.msra.mxu1 %v125_v21  ;;  %v122_v24 = vld [vmem:[#allocation2 + $0xe0] sm:$0xff]  ;;  %v121_v25 = vld [vmem:[#allocation2 + $0xd8] sm:$0xff]  ;;  %v120_v26 = vld [vmem:[#allocation2 + $0xd0] sm:$0xff] }
   0xe   :  { %v119_v27 = vld [vmem:[#allocation2 + $0xc8] sm:$0xff]  ;;  %v38_v28 = vld [vmem:[%s315_s1] sm:$0xf]  ;;  %v117_v33 = vld [vmem:[#allocation2 + $0xb8] sm:$0xff]  ;;  %s265_s1 = smov [#allocation5]  }
   0xf   :  { %91 = vmatpush.msra.mxu0 %v83_v6  ;;  %128 = vmatpush.msra.mxu1 %v124_v22  ;;  %v118_v31 = vld [vmem:[#allocation2 + $0xc0] sm:$0xff]  ;;  %v46_v32 = vperm.slane %v38_v28, 0  ;;  %v116_v35 = vld [vmem:[#allocation2 + $0xb0] sm:$0xff]  ;;  %v53_v38 = vperm.slane %v38_v28, 1  ;;  %v115_v39 = vld [vmem:[#allocation2 + $0xa8] sm:$0xff]  ;;  %v60_v40 = vperm.slane %v38_v28, 2 }
  0x10   :  { %202 = vset.pattern.permute.xlu0 %v263_v8  ;;  %204 = vset.pattern.permute.xlu1 %v264_v9  ;;  %v37_v34 = vld [vmem:[%s317_s3] sm:$0x7]  ;;  %v67_v41 = vperm.slane %v38_v28, 3  ;;  %v113_v47 = vld [vmem:[#allocation2 + $0x98] sm:$0xff]  ;;  %v112_v54 = vld [vmem:[#allocation2 + $0x90] sm:$0xff]  ;;  %s177_s3 = sshll.u32 %s265_s1, 4  ;;  %s178_s3 = int_to_ptr.vmem [resolvable:$true] %s177_s3 }
  0x11   :  { %50 = vperm.xlu0 %202, %v36_v2   ;;  %64 = vperm.xlu1 %204, %v36_v2   ;;  %v39_v36 = vperm.slane %v37_v34, 0  ;;  %v114_v42 = vld [vmem:[#allocation2 + $0xa0] sm:$0xff]  ;;  %v111_v55 = vld [vmem:[#allocation2 + $0x88] sm:$0xff]  ;;  %v87_v57 = vperm.slane %v37_v34, 1  ;;  %v126_v63 = vperm.slane %v37_v34, 2 }
  0x12   :  { %92 = vmatpush.msra.mxu0 %v82_v7  ;;  %129 = vmatpush.msra.mxu1 %v123_v23  ;;  %v110_v56 = vld [vmem:[#allocation2 + $0x80] sm:$0xff] }
  0x14   :  { %93 = vmatpush.msra.mxu0 %v81_v10  ;;  %130 = vmatpush.msra.mxu1 %v122_v24 }
  0x16   :  { %94 = vmatpush.msra.mxu0 %v80_v11  ;;  %131 = vmatpush.msra.mxu1 %v121_v25 }
  0x18   :  { %95 = vmatpush.msra.mxu0 %v79_v12  ;;  %132 = vmatpush.msra.mxu1 %v120_v26 }
  0x19   :  { %205 = vset.pattern.permute.xlu0 %v264_v9 }
  0x1a   :  { %96 = vmatpush.msra.mxu0 %v78_v13  ;;  %133 = vmatpush.msra.mxu1 %v119_v27 }
  0x1c   :  { %97 = vmatpush.msra.mxu0 %v77_v14  ;;  %134 = vmatpush.msra.mxu1 %v118_v31 }
  0x1e   :  { %98 = vmatpush.msra.mxu0 %v76_v15  ;;  %135 = vmatpush.msra.mxu1 %v117_v33 }
  0x20   :  { %99 = vmatpush.msra.mxu0 %v75_v16  ;;  %136 = vmatpush.msra.mxu1 %v116_v35 }
  0x22   :  { %100 = vmatpush.msra.mxu0 %v74_v17  ;;  %137 = vmatpush.msra.mxu1 %v115_v39 }
  0x24   :  { %101 = vmatpush.msra.mxu0 %v73_v18  ;;  %138 = vmatpush.msra.mxu1 %v114_v42 }
  0x26   :  { %102 = vmatpush.msra.mxu0 %v72_v19  ;;  %139 = vmatpush.msra.mxu1 %v113_v47 }
  0x28   :  { %103 = vmatpush.msra.mxu0 %v71_v20  ;;  %140 = vmatpush.msra.mxu1 %v112_v54 }
  0x2a   :  { %141 = vmatpush.msra.mxu1 %v111_v55 }
  0x2c   :  { %142 = vmatpush.msra.mxu1 %v110_v56 }
  0x7a   :  { %v44_v29 = vpop.permute.xlu0 %43  ;;  %v58_v30 = vpop.permute.xlu1 %57 }
  0x7b   :  { %v47_v37 = vmul.f32 %v46_v32, %v44_v29  ;;  %v61_v48 = vmul.f32 %v60_v40, %v58_v30 }
  0x7d   :  { %v48_v45 = vadd.f32 %v47_v37, %v39_v36 }
  0x83   :  { %v51_v43 = vpop.permute.xlu0 %50  ;;  %v65_v44 = vpop.permute.xlu1 %64 }
  0x84   :  { %v54_v46 = vmul.f32 %v53_v38, %v51_v43  ;;  %v68_v50 = vmul.f32 %v67_v41, %v65_v44 }
  0x86   :  { %v55_v49 = vadd.f32 %v54_v46, %v48_v45 }
  0x88   :  { %v62_v51 = vadd.f32 %v61_v48, %v55_v49 }
  0x8a   :  { %v69_v52 = vadd.f32 %v68_v50, %v62_v51 }
  0x8c   :  { %v70_v53 = vmax.f32 %v69_v52, 0.0 }
  0x8e   :  { %104 = vmatmul.f32.vlgmr.msra.gmra.mxu0 %v70_v53 }
 0x10b   :  { %v105_v58 = vpop.f32.mrf.mxu0 }
 0x10c   :  { %v106_v59 = vadd.f32 %v105_v58, %v87_v57 }
 0x10e   :  { %v108_v60 = vmax.f32 %v106_v59, 0.0 }
 0x110   :  { %143 = vmatmul.f32.vlgmr.msra.gmra.mxu1 %v108_v60 }
 0x18d   :  { %v144_v0 = vpop.f32.mrf.mxu1 }
 0x18e   :  { %v145_v1 = vadd.f32 %v144_v0, %v126_v63 }
 0x190   :  { %147 = vst [vmem:[#allocation5] sm:$0xff] %v145_v1  ;;  %v151_v2 = vsel %vm150_vm0, %v145_v1, -inf }
 0x191   :  { %152 = vmax.xlane.f32.xlu2 %v151_v2  ;;  %182 = dma.vmem_to_hbm [thread:$0]  %s178_s3, 128, %s180_s6, [#allocation4]  }
 0x204   :  { %v153_v3 = vpop.xlane.xlu2 %152 }
 0x205   :  { %vm154_vm1 = vcmp.eq.f32.partialorder %v151_v2, %v153_v3 }
 0x206   :  { %v155_v4 = vsel %vm154_vm1, %v149_v62, 128 }
 0x207   :  { %v157_v5 = vshra.s32 %v155_v4, 16  ;;  %v156_v7 = vand.u32 65535, %v155_v4 }
 0x209   :  { %v159_v6 = vcvt.s32.f32 %v157_v5  ;;  %v158_v9 = vcvt.s32.f32 %v156_v7 }
 0x20b   :  { %160 = vmin.xlane.f32.xlu2 %v159_v6 }
 0x27e   :  { %v161_v8 = vpop.xlane.xlu2 %160 }
 0x27f   :  { %vm162_vm2 = vcmp.eq.f32.partialorder %v159_v6, %v161_v8  ;;  %v167_v11 = vcvt.f32.s32 %v161_v8 }
 0x280   :  { %v163_v10 = vsel %vm162_vm2, %v158_v9, inf }
 0x281   :  { %164 = vmin.xlane.f32.xlu1 %v163_v10  ;;  %v168_v13 = vshll.u32 %v167_v11, 16 }
 0x2f4   :  { %v165_v12 = vpop.xlane.xlu1 %164 }
 0x2f5   :  { %v166_v14 = vcvt.f32.s32 %v165_v12 }
 0x2f7   :  { %v169_v15 = vadd.s32 %v168_v13, %v166_v14 }
 0x2f9   :  { %171 = vst.msk [vmem:[%s319_s5] sm:$0xff] %vm170_vm3, %v169_v15 }
 0x2fa   :  { %256 = dma.done.wait [#allocation4], 128  }
 0x2fb   :  { %257 = vsyncadd [#allocation4], 4294967168 }
 0x2fc   :  { %191 = vsyncpa [#allocation3], 1 }
 0x2fd   :  { %192 = vsyncpa [#allocation4], 1 }

</bundles_post_ra>
